<compile_context>
chip_gen: v6e
topology: v6e:2x2x1
jax: 0.10.0
libtpu: 0.0.40
codegen_flags: <defaults>
</compile_context>

<pallas_src>
import functools

import jax
import jax.numpy as jnp
from jax.experimental import pallas as pl
from jax.experimental.pallas import tpu as pltpu

BN_EPS = 1e-5
_VMEM_LIMIT = 32 * 1024 * 1024  # safe on v5e/v6e (128 MiB) and v7x (64 MiB)


def _pick_batch_tile(N, C_in, C_out, L, K, *, cap=8, vmem_budget=24 << 20):
    """Largest divisor of N that fits a conservative per-row VMEM budget."""
    # double-buffered input + output blocks + in-flight f32 intermediates
    per_row = 4 * L * ((K + 2) * C_in + 6 * C_out) + 4 * C_in * (K - 1)
    tb_max = max(1, min(cap, vmem_budget // max(per_row, 1)))
    tb = 1
    for d in range(1, min(N, tb_max) + 1):
        if N % d == 0:
            tb = d
    return tb


def _conv_row(x_row, w_ref, b_ref, *, K, left, compute_dtype):
    """Conv1d('same', stride 1) for one batch row as a single MXU matmul.

    x_row: (C_in, L) f32        channels on sublanes, L on lanes
    w_ref: (C_out, K*C_in)      flattened weight, already in compute_dtype
    b_ref: (C_out, 1) f32       conv bias
    returns (C_out, L) f32 accumulator.
    """
    C_in, L = x_row.shape
    right = (K - 1) - left

    # Fused 'same' zero padding, built in VMEM (no HBM pad round-trip).
    parts = []
    if left:
        parts.append(jnp.zeros((C_in, left), x_row.dtype))
    parts.append(x_row)
    if right:
        parts.append(jnp.zeros((C_in, right), x_row.dtype))
    xp = parts[0] if len(parts) == 1 else jnp.concatenate(parts, axis=1)

    # In-register im2col: stack the K shifted windows along the contraction dim
    # so the whole conv is one (C_out, K*C_in) @ (K*C_in, L) matmul.
    cols = [xp[:, k:k + L] for k in range(K)]
    xs = cols[0] if K == 1 else jnp.concatenate(cols, axis=0)   # (K*C_in, L)

    acc = jax.lax.dot_general(
        w_ref[...], xs.astype(compute_dtype),
        dimension_numbers=(((1,), (0,)), ((), ())),
        preferred_element_type=jnp.float32)          # (C_out, L) f32
    return acc + b_ref[...]


def _conv_stats_kernel(x_ref, w_ref, b_ref, stats_ref, *, K, left, TB,
                       compute_dtype):
    """Pass 1: conv + bias; accumulate per-channel sum / sumsq over (N, L)."""
    @pl.when(pl.program_id(0) == 0)
    def _():
        stats_ref[...] = jnp.zeros_like(stats_ref)

    total = None
    for t in range(TB):                                   # static unroll, TB<=8
        acc = _conv_row(x_ref[t], w_ref, b_ref, K=K, left=left,
                        compute_dtype=compute_dtype)      # (C_out, L) f32
        s = jnp.sum(acc, axis=1, keepdims=True)           # (C_out, 1)
        ss = jnp.sum(acc * acc, axis=1, keepdims=True)    # (C_out, 1)
        part = jnp.concatenate([s, ss], axis=1)           # (C_out, 2)
        total = part if total is None else total + part

    stats_ref[...] += total


def _bn_swish_kernel(x_ref, w_ref, b_ref, scale_ref, shift_ref, o_ref, *,
                     K, left, TB, compute_dtype):
    """Pass 2: recompute conv, apply precomputed BN scale/shift, Swish."""
    scale = scale_ref[...]                                # (C_out, 1) f32
    shift = shift_ref[...]                                # (C_out, 1) f32
    for t in range(TB):                                   # static unroll, TB<=8
        acc = _conv_row(x_ref[t], w_ref, b_ref, K=K, left=left,
                        compute_dtype=compute_dtype)      # (C_out, L) f32
        y = acc * scale + shift                           # BN in f32
        o_ref[t] = (y * jax.nn.sigmoid(y)).astype(o_ref.dtype)  # Swish


def embedder_forward(x_ncl, w_ock, bias, gamma, beta, *,
                     compute_dtype=jnp.bfloat16):
    """Forward of Embedder.

    x_ncl: (N, C_in, L) float32  -- native PyTorch Conv1d layout (kept as-is).
    w_ock: (C_out, C_in, K) float32 -- PyTorch Conv1d weight layout.
    Returns (N, C_out, L) float32.
    """
    N, C_in, L = x_ncl.shape
    C_out, _, K = w_ock.shape
    left = (K - 1) // 2

    x = x_ncl.astype(jnp.float32)
    # Flatten the weight to (C_out, K*C_in) matching the in-kernel im2col
    # ordering (window index major, input channel minor).
    w2 = jnp.transpose(w_ock, (0, 2, 1)).reshape(C_out, K * C_in)
    w2 = w2.astype(compute_dtype)
    b2 = bias.reshape(C_out, 1).astype(jnp.float32)

    TB = _pick_batch_tile(N, C_in, C_out, L, K)
    G = N // TB

    x_spec = pl.BlockSpec((TB, C_in, L), lambda n: (n, 0, 0))
    w_spec = pl.BlockSpec((C_out, K * C_in), lambda n: (0, 0))
    cvec_spec = pl.BlockSpec((C_out, 1), lambda n: (0, 0))
    stats_spec = pl.BlockSpec((C_out, 2), lambda n: (0, 0))
    out_spec = pl.BlockSpec((TB, C_out, L), lambda n: (n, 0, 0))

    itemsize = jnp.dtype(compute_dtype).itemsize
    conv_flops = 2 * N * L * K * C_in * C_out
    x_bytes = N * C_in * L * 4
    w_bytes = C_out * K * C_in * itemsize

    # ---- Pass 1: per-channel sum / sum-of-squares of conv(x)+bias over (N,L).
    stats = pl.pallas_call(
        functools.partial(_conv_stats_kernel, K=K, left=left, TB=TB,
                          compute_dtype=compute_dtype),
        out_shape=jax.ShapeDtypeStruct((C_out, 2), jnp.float32),
        grid=(G,),
        in_specs=[x_spec, w_spec, cvec_spec],
        out_specs=stats_spec,
        compiler_params=pltpu.CompilerParams(
            dimension_semantics=("arbitrary",),     # accumulator across grid
            vmem_limit_bytes=_VMEM_LIMIT),
        cost_estimate=pl.CostEstimate(
            flops=conv_flops + 4 * N * L * C_out, transcendentals=0,
            bytes_accessed=x_bytes + w_bytes + C_out * 2 * 4),
    )(x, w2, b2)

    # ---- Fold BN stats into a single per-channel scale/shift (tiny JAX glue).
    inv_count = 1.0 / float(N * L)
    mean = stats[:, 0:1] * inv_count                         # (C_out, 1)
    var = jnp.maximum(stats[:, 1:2] * inv_count - mean * mean, 0.0)  # biased
    scale = gamma.reshape(C_out, 1).astype(jnp.float32) * jax.lax.rsqrt(
        var + BN_EPS)                                        # (C_out, 1)
    shift = beta.reshape(C_out, 1).astype(jnp.float32) - mean * scale

    # ---- Pass 2: recompute the cheap conv, normalize + Swish, store NCL.
    out = pl.pallas_call(
        functools.partial(_bn_swish_kernel, K=K, left=left, TB=TB,
                          compute_dtype=compute_dtype),
        out_shape=jax.ShapeDtypeStruct((N, C_out, L), jnp.float32),
        grid=(G,),
        in_specs=[x_spec, w_spec, cvec_spec, cvec_spec, cvec_spec],
        out_specs=out_spec,
        compiler_params=pltpu.CompilerParams(
            dimension_semantics=("parallel",),      # megacore-shardable (v7x)
            vmem_limit_bytes=_VMEM_LIMIT),
        cost_estimate=pl.CostEstimate(
            flops=conv_flops + 6 * N * L * C_out,
            transcendentals=N * L * C_out,
            bytes_accessed=x_bytes + w_bytes + N * C_out * L * 4),
    )(x, w2, b2, scale, shift)
    return out


def reference_forward(x_ncl, w_ock, bias, gamma, beta):
    """Pure-JAX f32 reference of the same forward (for correctness checks)."""
    N, C_in, L = x_ncl.shape
    C_out, _, K = w_ock.shape
    left = (K - 1) // 2
    xp = jnp.pad(x_ncl, ((0, 0), (0, 0), (left, (K - 1) - left)))
    acc = jnp.zeros((N, C_out, L), jnp.float32)
    for k in range(K):
        acc = acc + jnp.einsum("ncl,dc->ndl", xp[:, :, k:k + L], w_ock[:, :, k],
                               preferred_element_type=jnp.float32)
    acc = acc + bias.reshape(1, -1, 1)
    mean = jnp.mean(acc, axis=(0, 2), keepdims=True)
    var = jnp.mean((acc - mean) ** 2, axis=(0, 2), keepdims=True)
    y = (acc - mean) / jnp.sqrt(var + BN_EPS)
    y = y * gamma.reshape(1, -1, 1) + beta.reshape(1, -1, 1)
    return y * jax.nn.sigmoid(y)


if __name__ == "__main__":
    # Small shapes consistent with the module: batch=2, d_input=4, seq=16,
    # d_embed=32, d_kernel=3.
    N, d_input, L = 2, 4, 16
    d_embed, d_kernel = 32, 3

    key = jax.random.PRNGKey(0)
    kx, kw, kb = jax.random.split(key, 3)

    x = jax.random.normal(kx, (N, d_input, L), dtype=jnp.float32)

    # Deterministic parameter init (Conv1d-style uniform bound, BN defaults),
    # weight in native PyTorch Conv1d layout (C_out, C_in, K).
    fan_in = d_input * d_kernel
    bound = 1.0 / (fan_in ** 0.5)
    w = jax.random.uniform(kw, (d_embed, d_input, d_kernel),
                           minval=-bound, maxval=bound, dtype=jnp.float32)
    b = jax.random.uniform(kb, (d_embed,), minval=-bound, maxval=bound,
                           dtype=jnp.float32)
    gamma = jnp.ones((d_embed,), jnp.float32)   # BN weight default
    beta = jnp.zeros((d_embed,), jnp.float32)   # BN bias default

    ref = reference_forward(x, w, b, gamma, beta)

    # Full-precision path (tight check of the kernel math / layout / BN).
    out_f32 = jax.block_until_ready(
        embedder_forward(x, w, b, gamma, beta, compute_dtype=jnp.float32))
    assert out_f32.shape == (N, d_embed, L)
    assert jnp.allclose(out_f32, ref, atol=1e-3, rtol=1e-3)

    # bf16 MXU operands (v6e/v7x fast path), f32 accumulation + f32 BN/Swish.
    out_bf16 = jax.block_until_ready(
        embedder_forward(x, w, b, gamma, beta, compute_dtype=jnp.bfloat16))
    assert out_bf16.shape == (N, d_embed, L)
    assert jnp.allclose(out_bf16, ref, atol=5e-2, rtol=5e-2)

    print("KERNEL_OK")
</pallas_src>

<mosaic_0001>
module attributes {stable_mosaic.version = 11 : i64} {
  func.func @_conv_stats_kernel(%arg0: i32, %arg1: memref<2x4x16xf32, #tpu.memory_space<vmem>>, %arg2: memref<32x12xf32, #tpu.memory_space<vmem>>, %arg3: memref<32x1xf32, #tpu.memory_space<vmem>>, %arg4: memref<32x2xf32, #tpu.memory_space<vmem>>) attributes {dimension_semantics = [#tpu.dimension_semantics<arbitrary>], iteration_bounds = array<i64: 1>, scalar_prefetch = 0 : i64, scratch_operands = 0 : i64, tpu.core_type = #tpu.core_type<tc>, window_params = [{transform_indices = @transform_0, window_bounds = array<i64: 2, 4, 16>}, {pipeline_mode = #tpu.pipeline_mode<synchronous>, transform_indices = @transform_1, window_bounds = array<i64: 32, 12>}, {pipeline_mode = #tpu.pipeline_mode<synchronous>, transform_indices = @transform_2, window_bounds = array<i64: 32, 1>}, {pipeline_mode = #tpu.pipeline_mode<synchronous>, transform_indices = @transform_3, window_bounds = array<i64: 32, 2>}]} {
    %c0_i32 = arith.constant 0 : i32
    %0 = arith.cmpi eq, %arg0, %c0_i32 : i32
    %1 = arith.extui %0 : i1 to i32
    %c0_i32_0 = arith.constant 0 : i32
    %2 = arith.cmpi ne, %1, %c0_i32_0 : i32
    scf.if %2 {
      %cst_26 = arith.constant 0.000000e+00 : f32
      %47 = vector.broadcast %cst_26 : f32 to vector<32x2xf32>
      %c0_27 = arith.constant 0 : index
      %c0_28 = arith.constant 0 : index
      %48 = vector.load %arg4[%c0_27, %c0_28] : memref<32x2xf32, #tpu.memory_space<vmem>>, vector<32x2xf32>
      tpu.vector_store %arg4[%c0_27, %c0_28], %47 {strides = array<i32>} : memref<32x2xf32, #tpu.memory_space<vmem>>, vector<32x2xf32>,
    } else {
    }
    %c0 = arith.constant 0 : index
    %c0_1 = arith.constant 0 : index
    %c0_2 = arith.constant 0 : index
    %3 = vector.load %arg1[%c0, %c0_1, %c0_2] : memref<2x4x16xf32, #tpu.memory_space<vmem>>, vector<1x4x16xf32>
    %4 = vector.shape_cast %3 : vector<1x4x16xf32> to vector<4x16xf32>
    %cst = arith.constant 0.000000e+00 : f32
    %5 = vector.broadcast %cst : f32 to vector<4x1xf32>
    %cst_3 = arith.constant 0.000000e+00 : f32
    %6 = vector.broadcast %cst_3 : f32 to vector<4x1xf32>
    %7 = tpu.concatenate %5, %4, %6 in 1 : vector<4x1xf32>, vector<4x16xf32>, vector<4x1xf32> -> vector<4x18xf32>
    %8 = vector.extract_strided_slice %7 {offsets = [0, 0], sizes = [4, 16], strides = [1, 1]} : vector<4x18xf32> to vector<4x16xf32>
    %9 = vector.extract_strided_slice %7 {offsets = [0, 1], sizes = [4, 16], strides = [1, 1]} : vector<4x18xf32> to vector<4x16xf32>
    %10 = vector.extract_strided_slice %7 {offsets = [0, 2], sizes = [4, 16], strides = [1, 1]} : vector<4x18xf32> to vector<4x16xf32>
    %11 = tpu.concatenate %8, %9, %10 in 0 : vector<4x16xf32>, vector<4x16xf32>, vector<4x16xf32> -> vector<12x16xf32>
    %c0_4 = arith.constant 0 : index
    %c0_5 = arith.constant 0 : index
    %12 = vector.load %arg2[%c0_4, %c0_5] : memref<32x12xf32, #tpu.memory_space<vmem>>, vector<32x12xf32>
    %cst_6 = arith.constant dense<0.000000e+00> : vector<32x16xf32>
    %13 = tpu.matmul %12, %11, %cst_6 {dimension_numbers = #tpu.dot_dimension_numbers<[1], [0], [0], [1], [0, 0, 1, 1], [], []>} : vector<32x12xf32>, vector<12x16xf32>, vector<32x16xf32> -> vector<32x16xf32>
    %c0_7 = arith.constant 0 : index
    %c0_8 = arith.constant 0 : index
    %14 = vector.load %arg3[%c0_7, %c0_8] : memref<32x1xf32, #tpu.memory_space<vmem>>, vector<32x1xf32>
    %15 = vector.broadcast %14 : vector<32x1xf32> to vector<32x16xf32>
    %16 = arith.addf %13, %15 : vector<32x16xf32>
    %cst_9 = arith.constant dense<0.000000e+00> : vector<32xf32>
    %17 = vector.multi_reduction <add>, %16, %cst_9 [1] : vector<32x16xf32> to vector<32xf32>
    %18 = vector.shape_cast %17 : vector<32xf32> to vector<32x1xf32>
    %19 = arith.mulf %16, %16 : vector<32x16xf32>
    %cst_10 = arith.constant dense<0.000000e+00> : vector<32xf32>
    %20 = vector.multi_reduction <add>, %19, %cst_10 [1] : vector<32x16xf32> to vector<32xf32>
    %21 = vector.shape_cast %20 : vector<32xf32> to vector<32x1xf32>
    %22 = tpu.concatenate %18, %21 in 1 : vector<32x1xf32>, vector<32x1xf32> -> vector<32x2xf32>
    %c1 = arith.constant 1 : index
    %c0_11 = arith.constant 0 : index
    %c0_12 = arith.constant 0 : index
    %23 = vector.load %arg1[%c1, %c0_11, %c0_12] : memref<2x4x16xf32, #tpu.memory_space<vmem>>, vector<1x4x16xf32>
    %24 = vector.shape_cast %23 : vector<1x4x16xf32> to vector<4x16xf32>
    %cst_13 = arith.constant 0.000000e+00 : f32
    %25 = vector.broadcast %cst_13 : f32 to vector<4x1xf32>
    %cst_14 = arith.constant 0.000000e+00 : f32
    %26 = vector.broadcast %cst_14 : f32 to vector<4x1xf32>
    %27 = tpu.concatenate %25, %24, %26 in 1 : vector<4x1xf32>, vector<4x16xf32>, vector<4x1xf32> -> vector<4x18xf32>
    %28 = vector.extract_strided_slice %27 {offsets = [0, 0], sizes = [4, 16], strides = [1, 1]} : vector<4x18xf32> to vector<4x16xf32>
    %29 = vector.extract_strided_slice %27 {offsets = [0, 1], sizes = [4, 16], strides = [1, 1]} : vector<4x18xf32> to vector<4x16xf32>
    %30 = vector.extract_strided_slice %27 {offsets = [0, 2], sizes = [4, 16], strides = [1, 1]} : vector<4x18xf32> to vector<4x16xf32>
    %31 = tpu.concatenate %28, %29, %30 in 0 : vector<4x16xf32>, vector<4x16xf32>, vector<4x16xf32> -> vector<12x16xf32>
    %c0_15 = arith.constant 0 : index
    %c0_16 = arith.constant 0 : index
    %32 = vector.load %arg2[%c0_15, %c0_16] : memref<32x12xf32, #tpu.memory_space<vmem>>, vector<32x12xf32>
    %cst_17 = arith.constant dense<0.000000e+00> : vector<32x16xf32>
    %33 = tpu.matmul %32, %31, %cst_17 {dimension_numbers = #tpu.dot_dimension_numbers<[1], [0], [0], [1], [0, 0, 1, 1], [], []>} : vector<32x12xf32>, vector<12x16xf32>, vector<32x16xf32> -> vector<32x16xf32>
    %c0_18 = arith.constant 0 : index
    %c0_19 = arith.constant 0 : index
    %34 = vector.load %arg3[%c0_18, %c0_19] : memref<32x1xf32, #tpu.memory_space<vmem>>, vector<32x1xf32>
    %35 = vector.broadcast %34 : vector<32x1xf32> to vector<32x16xf32>
    %36 = arith.addf %33, %35 : vector<32x16xf32>
    %cst_20 = arith.constant dense<0.000000e+00> : vector<32xf32>
    %37 = vector.multi_reduction <add>, %36, %cst_20 [1] : vector<32x16xf32> to vector<32xf32>
    %38 = vector.shape_cast %37 : vector<32xf32> to vector<32x1xf32>
    %39 = arith.mulf %36, %36 : vector<32x16xf32>
    %cst_21 = arith.constant dense<0.000000e+00> : vector<32xf32>
    %40 = vector.multi_reduction <add>, %39, %cst_21 [1] : vector<32x16xf32> to vector<32xf32>
    %41 = vector.shape_cast %40 : vector<32xf32> to vector<32x1xf32>
    %42 = tpu.concatenate %38, %41 in 1 : vector<32x1xf32>, vector<32x1xf32> -> vector<32x2xf32>
    %43 = arith.addf %22, %42 : vector<32x2xf32>
    %c0_22 = arith.constant 0 : index
    %c0_23 = arith.constant 0 : index
    %44 = vector.load %arg4[%c0_22, %c0_23] : memref<32x2xf32, #tpu.memory_space<vmem>>, vector<32x2xf32>
    %45 = arith.addf %44, %43 : vector<32x2xf32>
    %c0_24 = arith.constant 0 : index
    %c0_25 = arith.constant 0 : index
    %46 = vector.load %arg4[%c0_24, %c0_25] : memref<32x2xf32, #tpu.memory_space<vmem>>, vector<32x2xf32>
    tpu.vector_store %arg4[%c0_24, %c0_25], %45 {strides = array<i32>} : memref<32x2xf32, #tpu.memory_space<vmem>>, vector<32x2xf32>,
    return
  }
  func.func @transform_0(%arg0: i32) -> (i32, i32, i32) {
    %c0_i32 = arith.constant 0 : i32
    %c0_i32_0 = arith.constant 0 : i32
    %c0_i32_1 = arith.constant 0 : i32
    return %arg0, %c0_i32, %c0_i32_0 : i32, i32, i32
  }
  func.func @transform_1(%arg0: i32) -> (i32, i32) {
    %c0_i32 = arith.constant 0 : i32
    %c0_i32_0 = arith.constant 0 : i32
    %c0_i32_1 = arith.constant 0 : i32
    return %c0_i32, %c0_i32_0 : i32, i32
  }
  func.func @transform_2(%arg0: i32) -> (i32, i32) {
    %c0_i32 = arith.constant 0 : i32
    %c0_i32_0 = arith.constant 0 : i32
    %c0_i32_1 = arith.constant 0 : i32
    return %c0_i32, %c0_i32_0 : i32, i32
  }
  func.func @transform_3(%arg0: i32) -> (i32, i32) {
    %c0_i32 = arith.constant 0 : i32
    %c0_i32_0 = arith.constant 0 : i32
    %c0_i32_1 = arith.constant 0 : i32
    return %c0_i32, %c0_i32_0 : i32, i32
  }
}

</mosaic_0001>

<bundles_post_ra>
// kernel: tpu_custom_call.1
= control target key start
LH: loop header
LB: loop body
LE: loop exit
PB: predicated region body
PF: predicated region fallthrough
CT: control target
= control target key end

     0   :  { %s408_s14 = smov 1   ;;  %vm69_vm0 = vcmask 97280   ;;  %vm28_vm1 = vcmask 7168   ;;  %vm30_vm2 = vcmask 138240   ;;  %s409_s19 = smov 126   ;;  %v411_v10 = vmov 0   ;;  %s547_s0 = inlined_call_operand.vmem [shape: f32[2,4,16], index: 0, kind: input, shape index: {}]   ;;  %s548_s1 = inlined_call_operand.vmem [shape: f32[32,12], index: 1, kind: input, shape index: {}]   ;;  %s549_s2 = inlined_call_operand.vmem [shape: f32[32,1], index: 2, kind: input, shape index: {}]   ;;  %s550_s3 = inlined_call_operand.vmem [shape: f32[32,2], index: 3, kind: output, shape index: {}]  }
   0x1   :  { %v23_v0 = vld [vmem:[%s547_s0] sm:$0xf]  ;;  %v363_v1 = vld [vmem:[%s547_s0 + $0x4] sm:$0xf]  ;;  %s410_s0 = smov 127   ;;  %407 = vset.pattern.permute.xlu1 %v411_v10  ;;  %406 = vset.pattern.permute.xlu0 %v411_v10  ;;  %v48_v13 = vld [vmem:[%s549_s2 + $0x18] sm:$0xff] }
   0x2   :  { %25 = vrot.lane.b32.xlu0 %v23_v0, %s408_s14  ;;  %v41_v2 = vld [vmem:[%s548_s1] sm:$0xff]  ;;  %v46_v14 = vld [vmem:[%s549_s2 + $0x8] sm:$0xff]  ;;  %v47_v15 = vld [vmem:[%s549_s2 + $0x10] sm:$0xff]  ;;  %vm39_vm3 = vcmask 1043456   ;;  %vm169_vm4 = vcmask 130048   ;;  %vm18_vm5 = vcmask 15360  }
   0x3   :  { %385 = vmatprep.mubr.msk.f32.mxu0 %vm69_vm0, %v41_v2  ;;  %395 = vmatprep.mubr.msk.f32.mxu1 %vm69_vm0, %v41_v2  ;;  %v45_v11 = vld [vmem:[%s549_s2] sm:$0xff]  ;;  %v42_v19 = vld [vmem:[%s548_s1 + $0x8] sm:$0xff]  ;;  %v43_v21 = vld [vmem:[%s548_s1 + $0x10] sm:$0xff]  ;;  %v412_v59 = vmov 0.0  }
   0x4   :  { %v44_v22 = vld [vmem:[%s548_s1 + $0x18] sm:$0xff]  ;;  %19 = vst.msk [vmem:[%s550_s3] sm:$0xff] %vm18_vm5, %v412_v59  ;;  %20 = vst.msk [vmem:[%s550_s3 + $0x8] sm:$0xff] %vm18_vm5, %v412_v59 }
   0x5   :  { %21 = vst.msk [vmem:[%s550_s3 + $0x10] sm:$0xff] %vm18_vm5, %v412_v59  ;;  %22 = vst.msk [vmem:[%s550_s3 + $0x18] sm:$0xff] %vm18_vm5, %v412_v59 }
   0x6   :  { %205 = vrot.lane.b32.xlu0 %v363_v1, %s408_s14 }
  0x74   :  { %v26_v3 = vpop.permute.xlu0 %25 }
  0x75   :  { %v29_v4 = vsel %vm28_vm1, 0.0, %v26_v3 }
  0x76   :  { %v31_v5 = vsel %vm30_vm2, %v29_v4, 0.0 }
  0x77   :  { %v33_v6 = vrot.slane %v31_v5, 4  ;;  %37 = vrot.lane.b32.xlu1 %v31_v5, %s409_s19 }
  0x78   :  { %v206_v7 = vpop.permute.xlu0 %205 }
  0x79   :  { %v208_v8 = vsel %vm28_vm1, 0.0, %v206_v7  ;;  %34 = vrot.lane.b32.xlu0 %v33_v6, %s410_s0 }
  0x7a   :  { %v209_v9 = vsel %vm30_vm2, %v208_v8, 0.0 }
  0x7b   :  { %215 = vrot.lane.b32.xlu1 %v209_v9, %s409_s19  ;;  %v211_v12 = vrot.slane %v209_v9, 4 }
  0x7d   :  { %51 = vperm.xlu0 %406, %v45_v11  }
  0x7f   :  { %212 = vrot.lane.b32.xlu1 %v211_v12, %s410_s0 }
  0x81   :  { %66 = vperm.xlu0 %406, %v48_v13  }
  0x83   :  { %56 = vperm.xlu1 %407, %v46_v14   ;;  %v341_v14 = vld [vmem:[%s550_s3] sm:$0xff] }
  0x87   :  { %61 = vperm.xlu1 %407, %v47_v15  }
  0xe9   :  { %v38_v16 = vpop.permute.xlu1 %37 }
  0xea   :  { %381 = vmatprep.subr.msk.mxu0 %vm39_vm3, %v38_v16 }
  0xeb   :  { %382 = vmatpush3.msk.msra.mxu0 %vm39_vm3, %v38_v16  ;;  %v35_v17 = vpop.permute.xlu0 %34 }
  0xec   :  { %v40_v18 = vsel %vm39_vm3, %v31_v5, %v35_v17 }
  0xed   :  { %v216_v20 = vpop.permute.xlu1 %215  ;;  %383 = vmatprep.subr.mxu0 %v40_v18 }
  0xee   :  { %384 = vmatpush3.msra.mxu0 %v40_v18  ;;  %391 = vmatprep.subr.msk.mxu1 %vm39_vm3, %v216_v20 }
  0xef   :  { %386 = vmatmul.mubr.msk.f32.vlgmr.msra.gmra.mxu0 %vm69_vm0, %v42_v19  ;;  %392 = vmatpush3.msk.msra.mxu1 %vm39_vm3, %v216_v20 }
  0xf0   :  { %388 = vmatprep.mubr.msk.f32.mxu0 %vm69_vm0, %v43_v21 }
  0xf1   :  { %v213_v23 = vpop.permute.xlu1 %212 }
  0xf2   :  { %v217_v24 = vsel %vm39_vm3, %v209_v9, %v213_v23 }
  0xf3   :  { %389 = vmatmul.mubr.msk.f32.gmra.mxu0 %vm69_vm0, %v44_v22  ;;  %393 = vmatprep.subr.mxu1 %v217_v24 }
  0xf4   :  { %394 = vmatpush3.msra.mxu1 %v217_v24 }
  0xf5   :  { %396 = vmatmul.mubr.msk.f32.vlgmr.msra.gmra.mxu1 %vm69_vm0, %v42_v19  ;;  %v342_v19 = vld [vmem:[%s550_s3 + $0x8] sm:$0xff] }
  0xf6   :  { %398 = vmatprep.mubr.msk.f32.mxu1 %vm69_vm0, %v43_v21 }
  0xf8   :  { %v52_v29 = vpop.permute.xlu0 %51 }
  0xf9   :  { %399 = vmatmul.mubr.msk.f32.gmra.mxu1 %vm69_vm0, %v44_v22 }
  0xfc   :  { %v67_v49 = vpop.permute.xlu0 %66 }
  0xfe   :  { %v57_v26 = vpop.permute.xlu1 %56 }
 0x102   :  { %v62_v42 = vpop.permute.xlu1 %61 }
 0x1af   :  { %v387_v25 = vpop.f32.mrf.mxu0 }
 0x1b0   :  { %v156_v27 = vadd.f32 %v387_v25, %v57_v26 }
 0x1b1   :  { %v150_v30 = vpop.f32.mrf.mxu0 }
 0x1b2   :  { %v173_v28 = vsel %vm169_vm4, %v156_v27, 0.0  ;;  %v151_v33 = vadd.f32 %v150_v30, %v52_v29  ;;  %v183_v41 = vmul.f32 %v156_v27, %v156_v27 }
 0x1b3   :  { %174 = vadd.xlane.f32.xlu0 %v173_v28  ;;  %v390_v39 = vpop.f32.mrf.mxu0 }
 0x1b4   :  { %v182_v38 = vmul.f32 %v151_v33, %v151_v33  ;;  %v170_v40 = vsel %vm169_vm4, %v151_v33, 0.0  ;;  %v189_v47 = vsel %vm169_vm4, %v183_v41, 0.0  ;;  %v166_v53 = vadd.f32 %v390_v39, %v67_v49 }
 0x1b5   :  { %v397_v31 = vpop.f32.mrf.mxu1  ;;  %v160_v45 = vpop.f32.mrf.mxu0 }
 0x1b6   :  { %v292_v32 = vadd.f32 %v397_v31, %v57_v26  ;;  %v186_v43 = vsel %vm169_vm4, %v182_v38, 0.0  ;;  %v161_v50 = vadd.f32 %v160_v45, %v62_v42  ;;  %v179_v58 = vsel %vm169_vm4, %v166_v53, 0.0 }
 0x1b7   :  { %v286_v34 = vpop.f32.mrf.mxu1  ;;  %v185_v63 = vmul.f32 %v166_v53, %v166_v53 }
 0x1b8   :  { %v287_v35 = vadd.f32 %v286_v34, %v52_v29  ;;  %v308_v36 = vsel %vm169_vm4, %v292_v32, 0.0  ;;  %v318_v48 = vmul.f32 %v292_v32, %v292_v32  ;;  %v176_v56 = vsel %vm169_vm4, %v161_v50, 0.0  ;;  %v343_v32 = vld [vmem:[%s550_s3 + $0x10] sm:$0xff] }
 0x1b9   :  { %309 = vadd.xlane.f32.xlu1 %v308_v36  ;;  %v400_v46 = vpop.f32.mrf.mxu1  ;;  %v184_v61 = vmul.f32 %v161_v50, %v161_v50  ;;  %v195_v2 = vsel %vm169_vm4, %v185_v63, 0.0 }
 0x1ba   :  { %v305_v37 = vsel %vm169_vm4, %v287_v35, 0.0  ;;  %v317_v44 = vmul.f32 %v287_v35, %v287_v35  ;;  %v324_v54 = vsel %vm169_vm4, %v318_v48, 0.0  ;;  %v302_v57 = vadd.f32 %v400_v46, %v67_v49 }
 0x1bb   :  { %306 = vadd.xlane.f32.xlu0 %v305_v37  ;;  %v296_v52 = vpop.f32.mrf.mxu1  ;;  %v192_v0 = vsel %vm169_vm4, %v184_v61, 0.0  ;;  %v344_v37 = vld [vmem:[%s550_s3 + $0x18] sm:$0xff] }
 0x1bc   :  { %v321_v51 = vsel %vm169_vm4, %v317_v44, 0.0  ;;  %v297_v55 = vadd.f32 %v296_v52, %v62_v42  ;;  %v314_v62 = vsel %vm169_vm4, %v302_v57, 0.0  ;;  %v320_v3 = vmul.f32 %v302_v57, %v302_v57 }
 0x1bd   :  { %171 = vadd.xlane.f32.xlu1 %v170_v40 }
 0x1be   :  { %v311_v60 = vsel %vm169_vm4, %v297_v55, 0.0  ;;  %v319_v1 = vmul.f32 %v297_v55, %v297_v55  ;;  %v330_v5 = vsel %vm169_vm4, %v320_v3, 0.0 }
 0x1bf   :  { %187 = vadd.xlane.f32.xlu0 %v186_v43 }
 0x1c0   :  { %v327_v4 = vsel %vm169_vm4, %v319_v1, 0.0 }
 0x1c1   :  { %190 = vadd.xlane.f32.xlu1 %v189_v47 }
 0x1c3   :  { %322 = vadd.xlane.f32.xlu0 %v321_v51 }
 0x1c5   :  { %325 = vadd.xlane.f32.xlu1 %v324_v54 }
 0x1c7   :  { %177 = vadd.xlane.f32.xlu0 %v176_v56 }
 0x1c9   :  { %180 = vadd.xlane.f32.xlu1 %v179_v58 }
 0x1cb   :  { %312 = vadd.xlane.f32.xlu0 %v311_v60 }
 0x1cd   :  { %315 = vadd.xlane.f32.xlu1 %v314_v62 }
 0x1cf   :  { %193 = vadd.xlane.f32.xlu0 %v192_v0 }
 0x1d1   :  { %196 = vadd.xlane.f32.xlu1 %v195_v2 }
 0x1d3   :  { %328 = vadd.xlane.f32.xlu0 %v327_v4 }
 0x1d5   :  { %331 = vadd.xlane.f32.xlu1 %v330_v5 }
 0x23c   :  { %v175_v6 = vpop.xlane.xlu0 %174 }
 0x242   :  { %v310_v7 = vpop.xlane.xlu1 %309 }
 0x244   :  { %v307_v8 = vpop.xlane.xlu0 %306 }
 0x246   :  { %v172_v9 = vpop.xlane.xlu1 %171 }
 0x248   :  { %v188_v10 = vpop.xlane.xlu0 %187 }
 0x249   :  { %v198_v13 = vsel %vm28_vm1, %v172_v9, %v188_v10 }
 0x24a   :  { %v191_v11 = vpop.xlane.xlu1 %190 }
 0x24b   :  { %v199_v18 = vsel %vm28_vm1, %v175_v6, %v191_v11 }
 0x24c   :  { %v323_v12 = vpop.xlane.xlu0 %322 }
 0x24d   :  { %v333_v15 = vsel %vm28_vm1, %v307_v8, %v323_v12 }
 0x24e   :  { %v337_v16 = vadd.f32 %v333_v15, %v198_v13  ;;  %v326_v17 = vpop.xlane.xlu1 %325 }
 0x24f   :  { %v334_v20 = vsel %vm28_vm1, %v310_v7, %v326_v17 }
 0x250   :  { %v345_v21 = vadd.f32 %v341_v14, %v337_v16  ;;  %v338_v22 = vadd.f32 %v334_v20, %v199_v18  ;;  %v178_v23 = vpop.xlane.xlu0 %177 }
 0x252   :  { %350 = vst.msk [vmem:[%s550_s3] sm:$0xff] %vm18_vm5, %v345_v21  ;;  %v346_v24 = vadd.f32 %v342_v19, %v338_v22  ;;  %v181_v25 = vpop.xlane.xlu1 %180 }
 0x254   :  { %351 = vst.msk [vmem:[%s550_s3 + $0x8] sm:$0xff] %vm18_vm5, %v346_v24  ;;  %v313_v26 = vpop.xlane.xlu0 %312 }
 0x256   :  { %v316_v27 = vpop.xlane.xlu1 %315 }
 0x258   :  { %v194_v28 = vpop.xlane.xlu0 %193 }
 0x259   :  { %v200_v31 = vsel %vm28_vm1, %v178_v23, %v194_v28 }
 0x25a   :  { %v197_v29 = vpop.xlane.xlu1 %196 }
 0x25b   :  { %v201_v36 = vsel %vm28_vm1, %v181_v25, %v197_v29 }
 0x25c   :  { %v329_v30 = vpop.xlane.xlu0 %328 }
 0x25d   :  { %v335_v33 = vsel %vm28_vm1, %v313_v26, %v329_v30 }
 0x25e   :  { %v339_v34 = vadd.f32 %v335_v33, %v200_v31  ;;  %v332_v35 = vpop.xlane.xlu1 %331 }
 0x25f   :  { %v336_v38 = vsel %vm28_vm1, %v316_v27, %v332_v35 }
 0x260   :  { %v347_v39 = vadd.f32 %v343_v32, %v339_v34  ;;  %v340_v40 = vadd.f32 %v336_v38, %v201_v36 }
 0x262   :  { %352 = vst.msk [vmem:[%s550_s3 + $0x10] sm:$0xff] %vm18_vm5, %v347_v39  ;;  %v348_v41 = vadd.f32 %v344_v37, %v340_v40 }
 0x264   :  { %353 = vst.msk [vmem:[%s550_s3 + $0x18] sm:$0xff] %vm18_vm5, %v348_v41 }

</bundles_post_ra>
